<compile_context>
chip_gen: v7x
topology: tpu7x:2x2x1
jax: 0.10.0
libtpu: 0.0.40
codegen_flags: <defaults>
</compile_context>

<pallas_src>
import jax
import jax.numpy as jnp
import numpy as np
from jax.experimental import pallas as pl
from jax.experimental.pallas import tpu as pltpu


# 3x3 tap offsets, ordered (kh major, kw minor) to match the weight reshape.
_TAPS = tuple((dh, dw) for dh in (-1, 0, 1) for dw in (-1, 0, 1))


def _make_basic_block_kernel(H, W):
    """Builds the fused BasicBlock kernel for a fixed spatial size H x W."""
    HW = H * W

    def kernel(x_ref, s1_ref, b1_ref, w1_ref, s2_ref, b2_ref, w2_ref,
               cb2_ref, mask_ref, o_ref, patch_ref):
        # x_ref    : (1, C, HW)  one image, channel-major, spatial flattened
        # s*/b*    : (C, 1)      folded BN scale / shift (cb1 folded into b2)
        # w*_ref   : (C, 9*C)    conv weights in im2col layout, bf16
        # cb2_ref  : (C, 1)      conv2 bias (added with the residual)
        # mask_ref : (9*C, HW)   1.0 where the (dh, dw) tap is in-bounds
        # o_ref    : (1, C, HW)  output
        # patch_ref: (9*C, HW)   f32 scratch (reused by both convs)
        C = x_ref.shape[1]

        def build_patch(src):
            # Write 9 flat-shifted copies of src (C, HW) into patch_ref.
            # A shift of d = dh*W + dw on the flattened (h*W + w) axis realises
            # the (dh, dw) spatial tap.  The wrapped tail is also written (so
            # every element of the scratch is defined each time) and is zeroed
            # later by mask_ref, which also implements the conv zero padding.
            for t, (dh, dw) in enumerate(_TAPS):
                d = dh * W + dw
                rows = slice(t * C, (t + 1) * C)
                if d == 0:
                    patch_ref[rows, :] = src
                elif d > 0:
                    patch_ref[rows, :HW - d] = src[:, d:]
                    patch_ref[rows, HW - d:] = src[:, :d]       # wrap (masked)
                else:  # d < 0
                    patch_ref[rows, -d:] = src[:, :HW + d]
                    patch_ref[rows, :-d] = src[:, HW + d:]      # wrap (masked)

        x = x_ref[0]                                    # (C, HW) identity (pre-BN)

        # --- BN1 (eval-mode, folded); relu1 = Identity ------------------------
        y = x * s1_ref[...] + b1_ref[...]

        # --- conv1: single im2col matmul (bf16 MXU inputs, f32 accumulation) --
        build_patch(y)
        p1 = (patch_ref[...] * mask_ref[...]).astype(jnp.bfloat16)
        h1 = jnp.dot(w1_ref[...], p1, preferred_element_type=jnp.float32)

        # --- BN2 (conv1 bias pre-folded into shift); relu2 = Identity ---------
        z = h1 * s2_ref[...] + b2_ref[...]

        # --- conv2: single im2col matmul ---------------------------------------
        build_patch(z)
        p2 = (patch_ref[...] * mask_ref[...]).astype(jnp.bfloat16)
        h2 = jnp.dot(w2_ref[...], p2, preferred_element_type=jnp.float32)

        # --- downsample = ShortCut(identity, conv path) = identity + x --------
        o_ref[0] = x + (h2 + cb2_ref[...])

    return kernel


def _tap_border_masks(C, H, W):
    """(9*C, H*W) f32: 1.0 where the (dh, dw)-shifted source pixel is in-bounds."""
    HW = H * W
    masks = np.zeros((9 * C, HW), np.float32)
    for t, (dh, dw) in enumerate(_TAPS):
        m = np.zeros((H, W), np.float32)
        m[max(0, -dh):min(H, H - dh), max(0, -dw):min(W, W - dw)] = 1.0
        masks[t * C:(t + 1) * C, :] = m.reshape(1, HW)
    return jnp.asarray(masks)


def basic_block_forward(x_nchw, p):
    """BasicBlock forward (stride=1, in_planes == planes). x_nchw: (N, C, H, W)."""
    N, C, H, W = x_nchw.shape
    HW = H * W
    x3 = x_nchw.astype(jnp.float32).reshape(N, C, HW)    # free reshape, no transpose

    # Folded BN / bias params (conv1 bias folded into BN2's shift).
    s1 = p["s1"].reshape(C, 1)
    b1 = p["b1"].reshape(C, 1)
    s2 = p["s2"].reshape(C, 1)
    b2p = (p["b2"] + p["s2"] * p["cb1"]).reshape(C, 1)
    cb2 = p["cb2"].reshape(C, 1)

    # (Cout, 9*Cin) im2col weight layout, pre-cast to bf16 for the MXU.
    w1 = jnp.transpose(p["w1_oihw"], (0, 2, 3, 1)).reshape(C, 9 * C).astype(jnp.bfloat16)
    w2 = jnp.transpose(p["w2_oihw"], (0, 2, 3, 1)).reshape(C, 9 * C).astype(jnp.bfloat16)

    masks = _tap_border_masks(C, H, W)

    def full(shape):  # whole-array block, identical for every grid step
        return pl.BlockSpec(shape, lambda n: (0, 0))

    out3 = pl.pallas_call(
        _make_basic_block_kernel(H, W),
        out_shape=jax.ShapeDtypeStruct((N, C, HW), jnp.float32),
        grid=(N,),                                        # one image per grid step
        in_specs=[
            pl.BlockSpec((1, C, HW), lambda n: (n, 0, 0)),    # x
            full((C, 1)), full((C, 1)),                       # BN1 scale / shift
            full((C, 9 * C)),                                 # conv1 weights (bf16)
            full((C, 1)), full((C, 1)),                       # BN2 scale / shift(+cb1)
            full((C, 9 * C)),                                 # conv2 weights (bf16)
            full((C, 1)),                                     # conv2 bias
            full((9 * C, HW)),                                # tap border masks
        ],
        out_specs=pl.BlockSpec((1, C, HW), lambda n: (n, 0, 0)),
        scratch_shapes=[pltpu.VMEM((9 * C, HW), jnp.float32)],   # im2col patches
        compiler_params=pltpu.CompilerParams(
            dimension_semantics=("parallel",)),            # megacore split on v7x
    )(x3, s1, b1, w1, s2, b2p, w2, cb2, masks)

    return out3.reshape(N, C, H, W)


def reference_forward(x_nchw, p):
    """Pure-JAX (XLA) reference for correctness checking."""
    def bn(x, s, b):
        return x * s[None, :, None, None] + b[None, :, None, None]

    def conv(x, w_oihw, b):
        y = jax.lax.conv_general_dilated(
            x, w_oihw, window_strides=(1, 1), padding=((1, 1), (1, 1)),
            dimension_numbers=("NCHW", "OIHW", "NCHW"))
        return y + b[None, :, None, None]

    identity = x_nchw
    h = conv(bn(x_nchw, p["s1"], p["b1"]), p["w1_oihw"], p["cb1"])
    h = conv(bn(h, p["s2"], p["b2"]), p["w2_oihw"], p["cb2"])
    return identity + h


def make_params(key, in_planes, planes):
    """Deterministic synthetic parameters matching BasicBlock.__init__ shapes."""
    ks = jax.random.split(key, 12)
    eps = 1e-5

    def bn_params(k0, k1, k2, k3, c):
        gamma = 1.0 + 0.1 * jax.random.normal(k0, (c,), jnp.float32)
        beta = 0.1 * jax.random.normal(k1, (c,), jnp.float32)
        rmean = 0.1 * jax.random.normal(k2, (c,), jnp.float32)
        rvar = jax.random.uniform(k3, (c,), jnp.float32, 0.5, 1.5)
        scale = gamma / jnp.sqrt(rvar + eps)
        shift = beta - rmean * scale
        return scale, shift

    s1, b1 = bn_params(ks[0], ks[1], ks[2], ks[3], in_planes)
    s2, b2 = bn_params(ks[4], ks[5], ks[6], ks[7], planes)

    w1_oihw = 0.1 * jax.random.normal(ks[8], (planes, in_planes, 3, 3), jnp.float32)
    cb1 = 0.1 * jax.random.normal(ks[9], (planes,), jnp.float32)
    w2_oihw = 0.1 * jax.random.normal(ks[10], (planes, planes, 3, 3), jnp.float32)
    cb2 = 0.1 * jax.random.normal(ks[11], (planes,), jnp.float32)

    return {"s1": s1, "b1": b1, "s2": s2, "b2": b2,
            "w1_oihw": w1_oihw, "cb1": cb1,
            "w2_oihw": w2_oihw, "cb2": cb2}


if __name__ == "__main__":
    key = jax.random.PRNGKey(0)
    k_x, k_p = jax.random.split(key)

    N, C, H, W = 2, 8, 16, 16            # in_planes == planes == 8, stride == 1
    x = jax.random.normal(k_x, (N, C, H, W), jnp.float32)
    params = make_params(k_p, in_planes=C, planes=C)

    out = jax.block_until_ready(basic_block_forward(x, params))
    ref = jax.block_until_ready(reference_forward(x, params))

    assert out.shape == (N, C, H, W) and out.dtype == jnp.float32
    np.testing.assert_allclose(np.asarray(out), np.asarray(ref),
                               rtol=5e-2, atol=5e-2)

    print("KERNEL_OK")
</pallas_src>

<mosaic_0001>
module attributes {stable_mosaic.version = 11 : i64} {
  func.func @kernel(%arg0: i32, %arg1: memref<1x8x256xf32, #tpu.memory_space<vmem>>, %arg2: memref<8x1xf32, #tpu.memory_space<vmem>>, %arg3: memref<8x1xf32, #tpu.memory_space<vmem>>, %arg4: memref<8x72xbf16, #tpu.memory_space<vmem>>, %arg5: memref<8x1xf32, #tpu.memory_space<vmem>>, %arg6: memref<8x1xf32, #tpu.memory_space<vmem>>, %arg7: memref<8x72xbf16, #tpu.memory_space<vmem>>, %arg8: memref<8x1xf32, #tpu.memory_space<vmem>>, %arg9: memref<72x256xf32, #tpu.memory_space<vmem>>, %arg10: memref<1x8x256xf32, #tpu.memory_space<vmem>>, %arg11: memref<72x256xf32, #tpu.memory_space<vmem>>) attributes {dimension_semantics = [#tpu.dimension_semantics<parallel>], iteration_bounds = array<i64: 2>, scalar_prefetch = 0 : i64, scratch_operands = 1 : i64, tpu.core_type = #tpu.core_type<tc>, window_params = [{transform_indices = @transform_0, window_bounds = array<i64: 1, 8, 256>}, {pipeline_mode = #tpu.pipeline_mode<synchronous>, transform_indices = @transform_1, window_bounds = array<i64: 8, 1>}, {pipeline_mode = #tpu.pipeline_mode<synchronous>, transform_indices = @transform_2, window_bounds = array<i64: 8, 1>}, {pipeline_mode = #tpu.pipeline_mode<synchronous>, transform_indices = @transform_3, window_bounds = array<i64: 8, 72>}, {pipeline_mode = #tpu.pipeline_mode<synchronous>, transform_indices = @transform_4, window_bounds = array<i64: 8, 1>}, {pipeline_mode = #tpu.pipeline_mode<synchronous>, transform_indices = @transform_5, window_bounds = array<i64: 8, 1>}, {pipeline_mode = #tpu.pipeline_mode<synchronous>, transform_indices = @transform_6, window_bounds = array<i64: 8, 72>}, {pipeline_mode = #tpu.pipeline_mode<synchronous>, transform_indices = @transform_7, window_bounds = array<i64: 8, 1>}, {pipeline_mode = #tpu.pipeline_mode<synchronous>, transform_indices = @transform_8, window_bounds = array<i64: 72, 256>}, {transform_indices = @transform_9, window_bounds = array<i64: 1, 8, 256>}]} {
    %c0 = arith.constant 0 : index
    %c0_0 = arith.constant 0 : index
    %c0_1 = arith.constant 0 : index
    %0 = vector.load %arg1[%c0, %c0_0, %c0_1] : memref<1x8x256xf32, #tpu.memory_space<vmem>>, vector<1x8x256xf32>
    %1 = vector.shape_cast %0 : vector<1x8x256xf32> to vector<8x256xf32>
    %c0_2 = arith.constant 0 : index
    %c0_3 = arith.constant 0 : index
    %2 = vector.load %arg2[%c0_2, %c0_3] : memref<8x1xf32, #tpu.memory_space<vmem>>, vector<8x1xf32>
    %3 = vector.broadcast %2 : vector<8x1xf32> to vector<8x256xf32>
    %4 = arith.mulf %1, %3 : vector<8x256xf32>
    %c0_4 = arith.constant 0 : index
    %c0_5 = arith.constant 0 : index
    %5 = vector.load %arg3[%c0_4, %c0_5] : memref<8x1xf32, #tpu.memory_space<vmem>>, vector<8x1xf32>
    %6 = vector.broadcast %5 : vector<8x1xf32> to vector<8x256xf32>
    %7 = arith.addf %4, %6 : vector<8x256xf32>
    %8 = vector.extract_strided_slice %7 {offsets = [0, 0], sizes = [8, 239], strides = [1, 1]} : vector<8x256xf32> to vector<8x239xf32>
    %c0_6 = arith.constant 0 : index
    %c17 = arith.constant 17 : index
    %9 = vector.load %arg11[%c0_6, %c17] : memref<72x256xf32, #tpu.memory_space<vmem>>, vector<8x239xf32>
    tpu.vector_store %arg11[%c0_6, %c17], %8 {strides = array<i32>} : memref<72x256xf32, #tpu.memory_space<vmem>>, vector<8x239xf32>,
    %10 = vector.extract_strided_slice %7 {offsets = [0, 239], sizes = [8, 17], strides = [1, 1]} : vector<8x256xf32> to vector<8x17xf32>
    %c0_7 = arith.constant 0 : index
    %c0_8 = arith.constant 0 : index
    %11 = vector.load %arg11[%c0_7, %c0_8] : memref<72x256xf32, #tpu.memory_space<vmem>>, vector<8x17xf32>
    tpu.vector_store %arg11[%c0_7, %c0_8], %10 {strides = array<i32>} : memref<72x256xf32, #tpu.memory_space<vmem>>, vector<8x17xf32>,
    %12 = vector.extract_strided_slice %7 {offsets = [0, 0], sizes = [8, 240], strides = [1, 1]} : vector<8x256xf32> to vector<8x240xf32>
    %c8 = arith.constant 8 : index
    %c16 = arith.constant 16 : index
    %13 = vector.load %arg11[%c8, %c16] : memref<72x256xf32, #tpu.memory_space<vmem>>, vector<8x240xf32>
    tpu.vector_store %arg11[%c8, %c16], %12 {strides = array<i32>} : memref<72x256xf32, #tpu.memory_space<vmem>>, vector<8x240xf32>,
    %14 = vector.extract_strided_slice %7 {offsets = [0, 240], sizes = [8, 16], strides = [1, 1]} : vector<8x256xf32> to vector<8x16xf32>
    %c8_9 = arith.constant 8 : index
    %c0_10 = arith.constant 0 : index
    %15 = vector.load %arg11[%c8_9, %c0_10] : memref<72x256xf32, #tpu.memory_space<vmem>>, vector<8x16xf32>
    tpu.vector_store %arg11[%c8_9, %c0_10], %14 {strides = array<i32>} : memref<72x256xf32, #tpu.memory_space<vmem>>, vector<8x16xf32>,
    %16 = vector.extract_strided_slice %7 {offsets = [0, 0], sizes = [8, 241], strides = [1, 1]} : vector<8x256xf32> to vector<8x241xf32>
    %c16_11 = arith.constant 16 : index
    %c15 = arith.constant 15 : index
    %17 = vector.load %arg11[%c16_11, %c15] : memref<72x256xf32, #tpu.memory_space<vmem>>, vector<8x241xf32>
    tpu.vector_store %arg11[%c16_11, %c15], %16 {strides = array<i32>} : memref<72x256xf32, #tpu.memory_space<vmem>>, vector<8x241xf32>,
    %18 = vector.extract_strided_slice %7 {offsets = [0, 241], sizes = [8, 15], strides = [1, 1]} : vector<8x256xf32> to vector<8x15xf32>
    %c16_12 = arith.constant 16 : index
    %c0_13 = arith.constant 0 : index
    %19 = vector.load %arg11[%c16_12, %c0_13] : memref<72x256xf32, #tpu.memory_space<vmem>>, vector<8x15xf32>
    tpu.vector_store %arg11[%c16_12, %c0_13], %18 {strides = array<i32>} : memref<72x256xf32, #tpu.memory_space<vmem>>, vector<8x15xf32>,
    %20 = vector.extract_strided_slice %7 {offsets = [0, 0], sizes = [8, 255], strides = [1, 1]} : vector<8x256xf32> to vector<8x255xf32>
    %c24 = arith.constant 24 : index
    %c1 = arith.constant 1 : index
    %21 = vector.load %arg11[%c24, %c1] : memref<72x256xf32, #tpu.memory_space<vmem>>, vector<8x255xf32>
    tpu.vector_store %arg11[%c24, %c1], %20 {strides = array<i32>} : memref<72x256xf32, #tpu.memory_space<vmem>>, vector<8x255xf32>,
    %22 = vector.extract_strided_slice %7 {offsets = [0, 255], sizes = [8, 1], strides = [1, 1]} : vector<8x256xf32> to vector<8x1xf32>
    %c24_14 = arith.constant 24 : index
    %c0_15 = arith.constant 0 : index
    %23 = vector.load %arg11[%c24_14, %c0_15] : memref<72x256xf32, #tpu.memory_space<vmem>>, vector<8x1xf32>
    tpu.vector_store %arg11[%c24_14, %c0_15], %22 {strides = array<i32>} : memref<72x256xf32, #tpu.memory_space<vmem>>, vector<8x1xf32>,
    %c32 = arith.constant 32 : index
    %c0_16 = arith.constant 0 : index
    %24 = vector.load %arg11[%c32, %c0_16] : memref<72x256xf32, #tpu.memory_space<vmem>>, vector<8x256xf32>
    tpu.vector_store %arg11[%c32, %c0_16], %7 {strides = array<i32>} : memref<72x256xf32, #tpu.memory_space<vmem>>, vector<8x256xf32>,
    %25 = vector.extract_strided_slice %7 {offsets = [0, 1], sizes = [8, 255], strides = [1, 1]} : vector<8x256xf32> to vector<8x255xf32>
    %c40 = arith.constant 40 : index
    %c0_17 = arith.constant 0 : index
    %26 = vector.load %arg11[%c40, %c0_17] : memref<72x256xf32, #tpu.memory_space<vmem>>, vector<8x255xf32>
    tpu.vector_store %arg11[%c40, %c0_17], %25 {strides = array<i32>} : memref<72x256xf32, #tpu.memory_space<vmem>>, vector<8x255xf32>,
    %27 = vector.extract_strided_slice %7 {offsets = [0, 0], sizes = [8, 1], strides = [1, 1]} : vector<8x256xf32> to vector<8x1xf32>
    %c40_18 = arith.constant 40 : index
    %c255 = arith.constant 255 : index
    %28 = vector.load %arg11[%c40_18, %c255] : memref<72x256xf32, #tpu.memory_space<vmem>>, vector<8x1xf32>
    tpu.vector_store %arg11[%c40_18, %c255], %27 {strides = array<i32>} : memref<72x256xf32, #tpu.memory_space<vmem>>, vector<8x1xf32>,
    %29 = vector.extract_strided_slice %7 {offsets = [0, 15], sizes = [8, 241], strides = [1, 1]} : vector<8x256xf32> to vector<8x241xf32>
    %c48 = arith.constant 48 : index
    %c0_19 = arith.constant 0 : index
    %30 = vector.load %arg11[%c48, %c0_19] : memref<72x256xf32, #tpu.memory_space<vmem>>, vector<8x241xf32>
    tpu.vector_store %arg11[%c48, %c0_19], %29 {strides = array<i32>} : memref<72x256xf32, #tpu.memory_space<vmem>>, vector<8x241xf32>,
    %31 = vector.extract_strided_slice %7 {offsets = [0, 0], sizes = [8, 15], strides = [1, 1]} : vector<8x256xf32> to vector<8x15xf32>
    %c48_20 = arith.constant 48 : index
    %c241 = arith.constant 241 : index
    %32 = vector.load %arg11[%c48_20, %c241] : memref<72x256xf32, #tpu.memory_space<vmem>>, vector<8x15xf32>
    tpu.vector_store %arg11[%c48_20, %c241], %31 {strides = array<i32>} : memref<72x256xf32, #tpu.memory_space<vmem>>, vector<8x15xf32>,
    %33 = vector.extract_strided_slice %7 {offsets = [0, 16], sizes = [8, 240], strides = [1, 1]} : vector<8x256xf32> to vector<8x240xf32>
    %c56 = arith.constant 56 : index
    %c0_21 = arith.constant 0 : index
    %34 = vector.load %arg11[%c56, %c0_21] : memref<72x256xf32, #tpu.memory_space<vmem>>, vector<8x240xf32>
    tpu.vector_store %arg11[%c56, %c0_21], %33 {strides = array<i32>} : memref<72x256xf32, #tpu.memory_space<vmem>>, vector<8x240xf32>,
    %35 = vector.extract_strided_slice %7 {offsets = [0, 0], sizes = [8, 16], strides = [1, 1]} : vector<8x256xf32> to vector<8x16xf32>
    %c56_22 = arith.constant 56 : index
    %c240 = arith.constant 240 : index
    %36 = vector.load %arg11[%c56_22, %c240] : memref<72x256xf32, #tpu.memory_space<vmem>>, vector<8x16xf32>
    tpu.vector_store %arg11[%c56_22, %c240], %35 {strides = array<i32>} : memref<72x256xf32, #tpu.memory_space<vmem>>, vector<8x16xf32>,
    %37 = vector.extract_strided_slice %7 {offsets = [0, 17], sizes = [8, 239], strides = [1, 1]} : vector<8x256xf32> to vector<8x239xf32>
    %c64 = arith.constant 64 : index
    %c0_23 = arith.constant 0 : index
    %38 = vector.load %arg11[%c64, %c0_23] : memref<72x256xf32, #tpu.memory_space<vmem>>, vector<8x239xf32>
    tpu.vector_store %arg11[%c64, %c0_23], %37 {strides = array<i32>} : memref<72x256xf32, #tpu.memory_space<vmem>>, vector<8x239xf32>,
    %39 = vector.extract_strided_slice %7 {offsets = [0, 0], sizes = [8, 17], strides = [1, 1]} : vector<8x256xf32> to vector<8x17xf32>
    %c64_24 = arith.constant 64 : index
    %c239 = arith.constant 239 : index
    %40 = vector.load %arg11[%c64_24, %c239] : memref<72x256xf32, #tpu.memory_space<vmem>>, vector<8x17xf32>
    tpu.vector_store %arg11[%c64_24, %c239], %39 {strides = array<i32>} : memref<72x256xf32, #tpu.memory_space<vmem>>, vector<8x17xf32>,
    %c0_25 = arith.constant 0 : index
    %c0_26 = arith.constant 0 : index
    %41 = vector.load %arg11[%c0_25, %c0_26] : memref<72x256xf32, #tpu.memory_space<vmem>>, vector<72x256xf32>
    %c0_27 = arith.constant 0 : index
    %c0_28 = arith.constant 0 : index
    %42 = vector.load %arg9[%c0_27, %c0_28] : memref<72x256xf32, #tpu.memory_space<vmem>>, vector<72x256xf32>
    %43 = arith.mulf %41, %42 : vector<72x256xf32>
    %44 = arith.truncf %43 : vector<72x256xf32> to vector<72x256xbf16>
    %c0_29 = arith.constant 0 : index
    %c0_30 = arith.constant 0 : index
    %45 = vector.load %arg4[%c0_29, %c0_30] : memref<8x72xbf16, #tpu.memory_space<vmem>>, vector<8x72xbf16>
    %cst = arith.constant dense<0.000000e+00> : vector<8x256xf32>
    %46 = tpu.matmul %45, %44, %cst {dimension_numbers = #tpu.dot_dimension_numbers<[1], [0], [0], [1], [0, 0, 1, 1], [], []>} : vector<8x72xbf16>, vector<72x256xbf16>, vector<8x256xf32> -> vector<8x256xf32>
    %c0_31 = arith.constant 0 : index
    %c0_32 = arith.constant 0 : index
    %47 = vector.load %arg5[%c0_31, %c0_32] : memref<8x1xf32, #tpu.memory_space<vmem>>, vector<8x1xf32>
    %48 = vector.broadcast %47 : vector<8x1xf32> to vector<8x256xf32>
    %49 = arith.mulf %46, %48 : vector<8x256xf32>
    %c0_33 = arith.constant 0 : index
    %c0_34 = arith.constant 0 : index
    %50 = vector.load %arg6[%c0_33, %c0_34] : memref<8x1xf32, #tpu.memory_space<vmem>>, vector<8x1xf32>
    %51 = vector.broadcast %50 : vector<8x1xf32> to vector<8x256xf32>
    %52 = arith.addf %49, %51 : vector<8x256xf32>
    %53 = vector.extract_strided_slice %52 {offsets = [0, 0], sizes = [8, 239], strides = [1, 1]} : vector<8x256xf32> to vector<8x239xf32>
    %c0_35 = arith.constant 0 : index
    %c17_36 = arith.constant 17 : index
    %54 = vector.load %arg11[%c0_35, %c17_36] : memref<72x256xf32, #tpu.memory_space<vmem>>, vector<8x239xf32>
    tpu.vector_store %arg11[%c0_35, %c17_36], %53 {strides = array<i32>} : memref<72x256xf32, #tpu.memory_space<vmem>>, vector<8x239xf32>,
    %55 = vector.extract_strided_slice %52 {offsets = [0, 239], sizes = [8, 17], strides = [1, 1]} : vector<8x256xf32> to vector<8x17xf32>
    %c0_37 = arith.constant 0 : index
    %c0_38 = arith.constant 0 : index
    %56 = vector.load %arg11[%c0_37, %c0_38] : memref<72x256xf32, #tpu.memory_space<vmem>>, vector<8x17xf32>
    tpu.vector_store %arg11[%c0_37, %c0_38], %55 {strides = array<i32>} : memref<72x256xf32, #tpu.memory_space<vmem>>, vector<8x17xf32>,
    %57 = vector.extract_strided_slice %52 {offsets = [0, 0], sizes = [8, 240], strides = [1, 1]} : vector<8x256xf32> to vector<8x240xf32>
    %c8_39 = arith.constant 8 : index
    %c16_40 = arith.constant 16 : index
    %58 = vector.load %arg11[%c8_39, %c16_40] : memref<72x256xf32, #tpu.memory_space<vmem>>, vector<8x240xf32>
    tpu.vector_store %arg11[%c8_39, %c16_40], %57 {strides = array<i32>} : memref<72x256xf32, #tpu.memory_space<vmem>>, vector<8x240xf32>,
    %59 = vector.extract_strided_slice %52 {offsets = [0, 240], sizes = [8, 16], strides = [1, 1]} : vector<8x256xf32> to vector<8x16xf32>
    %c8_41 = arith.constant 8 : index
    %c0_42 = arith.constant 0 : index
    %60 = vector.load %arg11[%c8_41, %c0_42] : memref<72x256xf32, #tpu.memory_space<vmem>>, vector<8x16xf32>
    tpu.vector_store %arg11[%c8_41, %c0_42], %59 {strides = array<i32>} : memref<72x256xf32, #tpu.memory_space<vmem>>, vector<8x16xf32>,
    %61 = vector.extract_strided_slice %52 {offsets = [0, 0], sizes = [8, 241], strides = [1, 1]} : vector<8x256xf32> to vector<8x241xf32>
    %c16_43 = arith.constant 16 : index
    %c15_44 = arith.constant 15 : index
    %62 = vector.load %arg11[%c16_43, %c15_44] : memref<72x256xf32, #tpu.memory_space<vmem>>, vector<8x241xf32>
    tpu.vector_store %arg11[%c16_43, %c15_44], %61 {strides = array<i32>} : memref<72x256xf32, #tpu.memory_space<vmem>>, vector<8x241xf32>,
    %63 = vector.extract_strided_slice %52 {offsets = [0, 241], sizes = [8, 15], strides = [1, 1]} : vector<8x256xf32> to vector<8x15xf32>
    %c16_45 = arith.constant 16 : index
    %c0_46 = arith.constant 0 : index
    %64 = vector.load %arg11[%c16_45, %c0_46] : memref<72x256xf32, #tpu.memory_space<vmem>>, vector<8x15xf32>
    tpu.vector_store %arg11[%c16_45, %c0_46], %63 {strides = array<i32>} : memref<72x256xf32, #tpu.memory_space<vmem>>, vector<8x15xf32>,
    %65 = vector.extract_strided_slice %52 {offsets = [0, 0], sizes = [8, 255], strides = [1, 1]} : vector<8x256xf32> to vector<8x255xf32>
    %c24_47 = arith.constant 24 : index
    %c1_48 = arith.constant 1 : index
    %66 = vector.load %arg11[%c24_47, %c1_48] : memref<72x256xf32, #tpu.memory_space<vmem>>, vector<8x255xf32>
    tpu.vector_store %arg11[%c24_47, %c1_48], %65 {strides = array<i32>} : memref<72x256xf32, #tpu.memory_space<vmem>>, vector<8x255xf32>,
    %67 = vector.extract_strided_slice %52 {offsets = [0, 255], sizes = [8, 1], strides = [1, 1]} : vector<8x256xf32> to vector<8x1xf32>
    %c24_49 = arith.constant 24 : index
    %c0_50 = arith.constant 0 : index
    %68 = vector.load %arg11[%c24_49, %c0_50] : memref<72x256xf32, #tpu.memory_space<vmem>>, vector<8x1xf32>
    tpu.vector_store %arg11[%c24_49, %c0_50], %67 {strides = array<i32>} : memref<72x256xf32, #tpu.memory_space<vmem>>, vector<8x1xf32>,
    %c32_51 = arith.constant 32 : index
    %c0_52 = arith.constant 0 : index
    %69 = vector.load %arg11[%c32_51, %c0_52] : memref<72x256xf32, #tpu.memory_space<vmem>>, vector<8x256xf32>
    tpu.vector_store %arg11[%c32_51, %c0_52], %52 {strides = array<i32>} : memref<72x256xf32, #tpu.memory_space<vmem>>, vector<8x256xf32>,
    %70 = vector.extract_strided_slice %52 {offsets = [0, 1], sizes = [8, 255], strides = [1, 1]} : vector<8x256xf32> to vector<8x255xf32>
    %c40_53 = arith.constant 40 : index
    %c0_54 = arith.constant 0 : index
    %71 = vector.load %arg11[%c40_53, %c0_54] : memref<72x256xf32, #tpu.memory_space<vmem>>, vector<8x255xf32>
    tpu.vector_store %arg11[%c40_53, %c0_54], %70 {strides = array<i32>} : memref<72x256xf32, #tpu.memory_space<vmem>>, vector<8x255xf32>,
    %72 = vector.extract_strided_slice %52 {offsets = [0, 0], sizes = [8, 1], strides = [1, 1]} : vector<8x256xf32> to vector<8x1xf32>
    %c40_55 = arith.constant 40 : index
    %c255_56 = arith.constant 255 : index
    %73 = vector.load %arg11[%c40_55, %c255_56] : memref<72x256xf32, #tpu.memory_space<vmem>>, vector<8x1xf32>
    tpu.vector_store %arg11[%c40_55, %c255_56], %72 {strides = array<i32>} : memref<72x256xf32, #tpu.memory_space<vmem>>, vector<8x1xf32>,
    %74 = vector.extract_strided_slice %52 {offsets = [0, 15], sizes = [8, 241], strides = [1, 1]} : vector<8x256xf32> to vector<8x241xf32>
    %c48_57 = arith.constant 48 : index
    %c0_58 = arith.constant 0 : index
    %75 = vector.load %arg11[%c48_57, %c0_58] : memref<72x256xf32, #tpu.memory_space<vmem>>, vector<8x241xf32>
    tpu.vector_store %arg11[%c48_57, %c0_58], %74 {strides = array<i32>} : memref<72x256xf32, #tpu.memory_space<vmem>>, vector<8x241xf32>,
    %76 = vector.extract_strided_slice %52 {offsets = [0, 0], sizes = [8, 15], strides = [1, 1]} : vector<8x256xf32> to vector<8x15xf32>
    %c48_59 = arith.constant 48 : index
    %c241_60 = arith.constant 241 : index
    %77 = vector.load %arg11[%c48_59, %c241_60] : memref<72x256xf32, #tpu.memory_space<vmem>>, vector<8x15xf32>
    tpu.vector_store %arg11[%c48_59, %c241_60], %76 {strides = array<i32>} : memref<72x256xf32, #tpu.memory_space<vmem>>, vector<8x15xf32>,
    %78 = vector.extract_strided_slice %52 {offsets = [0, 16], sizes = [8, 240], strides = [1, 1]} : vector<8x256xf32> to vector<8x240xf32>
    %c56_61 = arith.constant 56 : index
    %c0_62 = arith.constant 0 : index
    %79 = vector.load %arg11[%c56_61, %c0_62] : memref<72x256xf32, #tpu.memory_space<vmem>>, vector<8x240xf32>
    tpu.vector_store %arg11[%c56_61, %c0_62], %78 {strides = array<i32>} : memref<72x256xf32, #tpu.memory_space<vmem>>, vector<8x240xf32>,
    %80 = vector.extract_strided_slice %52 {offsets = [0, 0], sizes = [8, 16], strides = [1, 1]} : vector<8x256xf32> to vector<8x16xf32>
    %c56_63 = arith.constant 56 : index
    %c240_64 = arith.constant 240 : index
    %81 = vector.load %arg11[%c56_63, %c240_64] : memref<72x256xf32, #tpu.memory_space<vmem>>, vector<8x16xf32>
    tpu.vector_store %arg11[%c56_63, %c240_64], %80 {strides = array<i32>} : memref<72x256xf32, #tpu.memory_space<vmem>>, vector<8x16xf32>,
    %82 = vector.extract_strided_slice %52 {offsets = [0, 17], sizes = [8, 239], strides = [1, 1]} : vector<8x256xf32> to vector<8x239xf32>
    %c64_65 = arith.constant 64 : index
    %c0_66 = arith.constant 0 : index
    %83 = vector.load %arg11[%c64_65, %c0_66] : memref<72x256xf32, #tpu.memory_space<vmem>>, vector<8x239xf32>
    tpu.vector_store %arg11[%c64_65, %c0_66], %82 {strides = array<i32>} : memref<72x256xf32, #tpu.memory_space<vmem>>, vector<8x239xf32>,
    %84 = vector.extract_strided_slice %52 {offsets = [0, 0], sizes = [8, 17], strides = [1, 1]} : vector<8x256xf32> to vector<8x17xf32>
    %c64_67 = arith.constant 64 : index
    %c239_68 = arith.constant 239 : index
    %85 = vector.load %arg11[%c64_67, %c239_68] : memref<72x256xf32, #tpu.memory_space<vmem>>, vector<8x17xf32>
    tpu.vector_store %arg11[%c64_67, %c239_68], %84 {strides = array<i32>} : memref<72x256xf32, #tpu.memory_space<vmem>>, vector<8x17xf32>,
    %c0_69 = arith.constant 0 : index
    %c0_70 = arith.constant 0 : index
    %86 = vector.load %arg11[%c0_69, %c0_70] : memref<72x256xf32, #tpu.memory_space<vmem>>, vector<72x256xf32>
    %c0_71 = arith.constant 0 : index
    %c0_72 = arith.constant 0 : index
    %87 = vector.load %arg9[%c0_71, %c0_72] : memref<72x256xf32, #tpu.memory_space<vmem>>, vector<72x256xf32>
    %88 = arith.mulf %86, %87 : vector<72x256xf32>
    %89 = arith.truncf %88 : vector<72x256xf32> to vector<72x256xbf16>
    %c0_73 = arith.constant 0 : index
    %c0_74 = arith.constant 0 : index
    %90 = vector.load %arg7[%c0_73, %c0_74] : memref<8x72xbf16, #tpu.memory_space<vmem>>, vector<8x72xbf16>
    %cst_75 = arith.constant dense<0.000000e+00> : vector<8x256xf32>
    %91 = tpu.matmul %90, %89, %cst_75 {dimension_numbers = #tpu.dot_dimension_numbers<[1], [0], [0], [1], [0, 0, 1, 1], [], []>} : vector<8x72xbf16>, vector<72x256xbf16>, vector<8x256xf32> -> vector<8x256xf32>
    %c0_76 = arith.constant 0 : index
    %c0_77 = arith.constant 0 : index
    %92 = vector.load %arg8[%c0_76, %c0_77] : memref<8x1xf32, #tpu.memory_space<vmem>>, vector<8x1xf32>
    %93 = vector.broadcast %92 : vector<8x1xf32> to vector<8x256xf32>
    %94 = arith.addf %91, %93 : vector<8x256xf32>
    %95 = arith.addf %1, %94 : vector<8x256xf32>
    %c0_78 = arith.constant 0 : index
    %c0_79 = arith.constant 0 : index
    %c0_80 = arith.constant 0 : index
    %96 = vector.load %arg10[%c0_78, %c0_79, %c0_80] : memref<1x8x256xf32, #tpu.memory_space<vmem>>, vector<1x8x256xf32>
    %97 = vector.shape_cast %96 : vector<1x8x256xf32> to vector<8x256xf32>
    %98 = vector.shape_cast %95 : vector<8x256xf32> to vector<1x8x256xf32>
    tpu.vector_store %arg10[%c0_78, %c0_79, %c0_80], %98 {strides = array<i32>} : memref<1x8x256xf32, #tpu.memory_space<vmem>>, vector<1x8x256xf32>,
    return
  }
  func.func @transform_0(%arg0: i32) -> (i32, i32, i32) {
    %c0_i32 = arith.constant 0 : i32
    %c0_i32_0 = arith.constant 0 : i32
    %c0_i32_1 = arith.constant 0 : i32
    return %arg0, %c0_i32, %c0_i32_0 : i32, i32, i32
  }
  func.func @transform_1(%arg0: i32) -> (i32, i32) {
    %c0_i32 = arith.constant 0 : i32
    %c0_i32_0 = arith.constant 0 : i32
    %c0_i32_1 = arith.constant 0 : i32
    return %c0_i32, %c0_i32_0 : i32, i32
  }
  func.func @transform_2(%arg0: i32) -> (i32, i32) {
    %c0_i32 = arith.constant 0 : i32
    %c0_i32_0 = arith.constant 0 : i32
    %c0_i32_1 = arith.constant 0 : i32
    return %c0_i32, %c0_i32_0 : i32, i32
  }
  func.func @transform_3(%arg0: i32) -> (i32, i32) {
    %c0_i32 = arith.constant 0 : i32
    %c0_i32_0 = arith.constant 0 : i32
    %c0_i32_1 = arith.constant 0 : i32
    return %c0_i32, %c0_i32_0 : i32, i32
  }
  func.func @transform_4(%arg0: i32) -> (i32, i32) {
    %c0_i32 = arith.constant 0 : i32
    %c0_i32_0 = arith.constant 0 : i32
    %c0_i32_1 = arith.constant 0 : i32
    return %c0_i32, %c0_i32_0 : i32, i32
  }
  func.func @transform_5(%arg0: i32) -> (i32, i32) {
    %c0_i32 = arith.constant 0 : i32
    %c0_i32_0 = arith.constant 0 : i32
    %c0_i32_1 = arith.constant 0 : i32
    return %c0_i32, %c0_i32_0 : i32, i32
  }
  func.func @transform_6(%arg0: i32) -> (i32, i32) {
    %c0_i32 = arith.constant 0 : i32
    %c0_i32_0 = arith.constant 0 : i32
    %c0_i32_1 = arith.constant 0 : i32
    return %c0_i32, %c0_i32_0 : i32, i32
  }
  func.func @transform_7(%arg0: i32) -> (i32, i32) {
    %c0_i32 = arith.constant 0 : i32
    %c0_i32_0 = arith.constant 0 : i32
    %c0_i32_1 = arith.constant 0 : i32
    return %c0_i32, %c0_i32_0 : i32, i32
  }
  func.func @transform_8(%arg0: i32) -> (i32, i32) {
    %c0_i32 = arith.constant 0 : i32
    %c0_i32_0 = arith.constant 0 : i32
    %c0_i32_1 = arith.constant 0 : i32
    return %c0_i32, %c0_i32_0 : i32, i32
  }
  func.func @transform_9(%arg0: i32) -> (i32, i32, i32) {
    %c0_i32 = arith.constant 0 : i32
    %c0_i32_0 = arith.constant 0 : i32
    %c0_i32_1 = arith.constant 0 : i32
    return %arg0, %c0_i32, %c0_i32_0 : i32, i32, i32
  }
}

</mosaic_0001>

<bundles_post_ra>
// kernel: tpu_custom_call.1
= control target key start
LH: loop header
LB: loop body
LE: loop exit
PB: predicated region body
PF: predicated region fallthrough
CT: control target
= control target key end

     0   :  { %14 = vsyncpa [#allocation4], 0  ;;  %s1517_s0 = inlined_call_operand.vmem [shape: f32[2,8,256], index: 0, kind: input, shape index: {}]   ;;  %s1518_s1 = inlined_call_operand.vmem [shape: f32[8,1], index: 1, kind: input, shape index: {}]   ;;  %s1519_s2 = inlined_call_operand.vmem [shape: f32[8,1], index: 2, kind: input, shape index: {}]   ;;  %s1520_s3 = inlined_call_operand.vmem [shape: bf16[8,72], index: 3, kind: input, shape index: {}]   ;;  %s1521_s4 = inlined_call_operand.vmem [shape: f32[8,1], index: 4, kind: input, shape index: {}]   ;;  %s1522_s5 = inlined_call_operand.vmem [shape: f32[8,1], index: 5, kind: input, shape index: {}]   ;;  %s1523_s6 = inlined_call_operand.vmem [shape: bf16[8,72], index: 6, kind: input, shape index: {}]   ;;  %s1524_s7 = inlined_call_operand.vmem [shape: f32[8,1], index: 7, kind: input, shape index: {}]   ;;  %s1525_s8 = inlined_call_operand.hbm [shape: f32[72,256], index: 8, kind: input, shape index: {}]   ;;  %s1526_s9 = inlined_call_operand.hbm [shape: f32[2,8,256], index: 9, kind: output, shape index: {}]  }
   0x1   :  { %15 = vsyncpa [#allocation5], 0 }
   0x2   :  { %17 = vsyncpa [#allocation5 + $0x1], 0  ;;  %s1151_s30 = smov 0   ;;  %s1153_s10 = smov 0  }
   0x3   :  { %s1155_s11 = smov 0   ;;  %s1157_s12 = smov 0  }
   0x4 LB: > { %s1172_s13 = sadd.s32 4294967295, %s1086_s12   ;;  %s909_s14 = sadd.s32 4294967294, %s1086_s12   ;;  %s1086_s12 = sphi %s1157_s12, %s1547_s12   ;;  %s1082_s11 = sphi %s1155_s11, %s1546_s11   ;;  %s1078_s10 = sphi %s1153_s10, %s1545_s10   ;;  %s1074_s30 = sphi %s1151_s30, %s1544_s30  }
   0x5   : > { %s1176_s15 = sadd.s32 1, %s1086_s12   ;;  %s224_s16 = sadd.s32 1, %s1082_s11 }
   0x6   : > { %s221_s17 = ssub.s32 %s1086_s12, %s1176_s15  ;;  %p234_p0 = scmp.ne.s32.totalorder %s1082_s11, %s1078_s10 }
   0x7   : > { %p222_p1 = scmp.eq.s32.totalorder %s221_s17, 0  ;;  %p235_p2 = scmp.eq.s32.totalorder %s1172_s13, 1 }
   0x8   : > { %p240_p3 = scmp.ne.s32.totalorder %s1078_s10, %s1074_s30  ;;  %p241_p4 = scmp.eq.s32.totalorder %s909_s14, 1 }
   0x9   : > { %s1187_s18 = scalar_select %p222_p1, %s1082_s11, %s224_s16  }
   0xa   : > { %p1189_p5 = por %p235_p2, %p234_p0  ;;  %p1193_p6 = por %p241_p4, %p240_p3 }
   0xb   : > { %p910_p7 = scmp.ge.s32.totalorder %s1086_s12, 1  ;;  %p248_p8 = scmp.lt.s32.totalorder %s1086_s12, 3 }
   0xc   : > { %s1532_s19 = scalar_select %p1189_p5, 1, 0 }
   0xd   : > { %s1533_s20 = scalar_select %p1193_p6, 1, 0 }
   0xe   : > { %p1527_p9 = scmp.eq.s32.totalorder %s1172_s13, 0  ;;  %p1200_p10 = pnand %p910_p7, %p248_p8 }
   0xf   : > { %s1088_s22 = smov [#allocation3]   ;;  %s992_s27 = scalar_lea.hbm %s1525_s8, 2304 }
  0x10   : > { %s1534_s21 = scalar_select %p1200_p10, 1, 0 }
  0x11   : > { %s281_s23 = sshll.u32 %s1088_s22, 4  ;;  %p935_p11 = pneg %p1200_p10  ;;  %s282_s23 = int_to_ptr.vmem [resolvable:$true] %s281_s23 }
  0x12   : > { %p993_p13 = scmp.ne.s32.totalorder %s1525_s8, %s992_s27  ;;  %p999_p3 = scmp.lt.u32.totalorder %s992_s27, %s1525_s8 }
  0x13   : > { %p1208_p12 = pnand %p1527_p9, %p935_p11 }
  0x15   : > { %p994_p0 = pneg %p1208_p12 }
  0x17   : > { %p995_p1 = pnand %p994_p0, %p993_p13 }
  0x19   : > { %p996_p2 = pneg %p995_p1 }
  0x1b   : > { %p1001_p4 = pnand %p999_p3, %p996_p2 }
  0x1d   : > { %1004 = shalt.err (!%p1001_p4)
}
  0x1e   : > { %s1005_s17 = scalar_lea.vmem %s282_s23, 2304  ;;  %p1013_p9 = scmp.lt.s32.totalorder %s282_s23, %s282_s23 }
  0x1f   : > { %p1006_p7 = scmp.ne.s32.totalorder %s282_s23, %s1005_s17  ;;  %p1014_p6 = scmp.lt.s32.totalorder %s1005_s17, %s1005_s17 }
  0x21   : > { %p1008_p8 = pnand %p1006_p7, %p994_p0  ;;  %p1015_p5 = por %p1014_p6, %p1013_p9 }
  0x23   : > { %p1009_p11 = pneg %p1008_p8 }
  0x25   : > { %p1016_p10 = pnand %p1015_p5, %p1009_p11 }
  0x27   : > { %1019 = shalt.err (!%p1016_p10)
}
  0x28   : > { %s1089_s22 = smov 256   ;;  %s1090_s25 = smov 16  }
  0x29   : > { %938 = dma.hbm_to_vmem [thread:$0]  (!%p1208_p12), %s1525_s8, 2304, %s282_s23, [#allocation4], %s1089_s22, %s1089_s22, %s1090_s25  }
  0x2a   : > { %p1536_p13 = scmp.ne.s32.totalorder %s1534_s21, 0 }
  0x2b   : > { %p1537_p1 = scmp.eq.s32.totalorder (!%p1536_p13), %s1172_s13, 0 }
  0x2c   : > { %305 = sbr.rel (%p1536_p13) target bundleno = 962 (0x3c2), region = 56 }
  0x33   : > { %1065 = dma.done.wait (%p1537_p1), [#allocation4], 2304   ;;  %p1538_p0 = pmov %p1537_p1 }
  0x34   : > { %v1091_v0 = vmov 0   ;;  %v349_v1 = vld [vmem:[%s1518_s1] sm:$0xff]  ;;  %p341_p5 = scmp.lt.s32.totalorder %s1172_s13, 1  ;;  %s1092_s25 = smov 16   ;;  %vm388_vm0 = vcmask 1047680   ;;  %vm375_vm1 = vcmask 1047688  }
  0x35   : > { %1067 = vsyncadd (%p1538_p0), [#allocation4], 4294964992  ;;  %990 = vset.pattern.permute.xlu0 %v1091_v0  ;;  %581 = vmatprep.mubr.bf16.mxu0 %v1091_v0  ;;  %v357_v2 = vld [vmem:[%s1519_s2] sm:$0xff]  ;;  %s1093_s26 = smov 17   ;;  %s1094_s28 = smov 15   ;;  %vm401_vm2 = vcmask 1047672  }
  0x36   : > { %991 = vset.pattern.permute.xlu1 %v1091_v0  ;;  %810 = vmatprep.mubr.bf16.mxu1 %v1091_v0  ;;  %s342_s29 = scalar_select %p341_p5, %s1172_s13, 1  ;;  %v590_v11 = vld [vmem:[%s1521_s4] sm:$0xff]  ;;  %vm371_vm3 = vcmask 138240   ;;  %vm414_vm4 = vcmask 1047560   ;;  %vm384_vm5 = vcmask 130048   ;;  %v1298_v18 = vld [vmem:[#allocation3 + $0x8] sm:$0xff] }
  0x37   : > { %352 = vperm.xlu0 %990, %v349_v1   ;;  %s1095_s24 = smov 1   ;;  %s1096_s27 = smov 127   ;;  %v598_v12 = vld [vmem:[%s1522_s5] sm:$0xff]  ;;  %v1300_v19 = vld [vmem:[#allocation3 + $0x18] sm:$0xff]  ;;  %vm425_vm6 = vcmask 1039360   ;;  %vm397_vm7 = vcmask 121856  }
  0x38   : > { %s927_s14 = sshll.u32 %s342_s29, 4  ;;  %s1097_s21 = smov 113   ;;  %vm438_vm8 = vcmask 924672   ;;  %vm410_vm9 = vcmask 7168   ;;  %v1309_v29 = vld [vmem:[#allocation3] sm:$0xff]  ;;  %v1311_v30 = vld [vmem:[#allocation3 + $0x10] sm:$0xff] }
  0x39   : > { %s345_s22 = scalar_lea.vmem %s1517_s0, %s927_s14  ;;  %s1098_s23 = smov 111   ;;  %v1314_v32 = vld [vmem:[#allocation3 + $0x28] sm:$0xff]  ;;  %v1316_v33 = vld [vmem:[#allocation3 + $0x38] sm:$0xff]  ;;  %vm445_vm10 = vcmask 1048456   ;;  %vm432_vm11 = vcmask 1048568   ;;  %vm451_vm12 = vcmask 916480  }
  0x3a   : > { %v1245_v4 = vld [vmem:[%s345_s22] sm:$0xff]  ;;  %v1248_v6 = vld [vmem:[%s345_s22 + $0x8] sm:$0xff]  ;;  %s1099_s29 = smov 112   ;;  %v1327_v47 = vld [vmem:[#allocation3 + $0x20] sm:$0xff]  ;;  %vm458_vm13 = vcmask 1048448   ;;  %vm1531_vm14 = vcmask 908288  }
  0x3b   : > { %360 = vperm.xlu0 %990, %v357_v2   ;;  %v1329_v48 = vld [vmem:[#allocation3 + $0x30] sm:$0xff]  ;;  %v1337_v55 = vld [vmem:[#allocation3 + $0x48] sm:$0xff]  ;;  %v1339_v56 = vld [vmem:[#allocation3 + $0x58] sm:$0xff]  ;;  %vm1530_vm15 = vcmask 1048440   ;;  %p1542_p9 = scmp.ne.s32.totalorder %s1532_s19, 0 }
  0x3c   : > { %v1335_v54 = vld [vmem:[#allocation3 + $0x50] sm:$0xff]  ;;  %v1341_v58 = vld [vmem:[#allocation3 + $0x40] sm:$0xff] }
  0xb6   : > { %v353_v3 = vpop.permute.xlu0 %352 }
  0xb7   : > { %v355_v5 = vmul.f32 %v353_v3, %v1245_v4  ;;  %v356_v9 = vmul.f32 %v353_v3, %v1248_v6 }
  0xba   : > { %v361_v7 = vpop.permute.xlu0 %360 }
  0xbb   : > { %v1250_v8 = vadd.f32 %v361_v7, %v355_v5  ;;  %v1257_v10 = vadd.f32 %v361_v7, %v356_v9  ;;  %v1352_v9 = vld [vmem:[#allocation3 + $0x70] sm:$0xff] }
  0xbd   : > { %380 = vrot.lane.b32.xlu0 %v1250_v8, %s1092_s25  ;;  %367 = vrot.lane.b32.xlu1 %v1250_v8, %s1093_s26  ;;  %v518_v62 = vmul.f32 %v1337_v55, %v1257_v10  ;;  %v517_v0 = vmul.f32 %v1341_v58, %v1250_v8 }
  0xc1   : > { %393 = vrot.lane.b32.xlu0 %v1250_v8, %s1094_s28  ;;  %369 = vrot.lane.b32.xlu1 %v1257_v10, %s1093_s26 }
  0xc5   : > { %406 = vrot.lane.b32.xlu0 %v1250_v8, %s1095_s24  ;;  %382 = vrot.lane.b32.xlu1 %v1257_v10, %s1092_s25 }
  0xc9   : > { %423 = vrot.lane.b32.xlu0 %v1257_v10, %s1096_s27  ;;  %395 = vrot.lane.b32.xlu1 %v1257_v10, %s1094_s28 }
  0xcd   : > { %436 = vrot.lane.b32.xlu0 %v1257_v10, %s1097_s21  ;;  %408 = vrot.lane.b32.xlu1 %v1257_v10, %s1095_s24 }
  0xd1   : > { %434 = vrot.lane.b32.xlu0 %v1250_v8, %s1097_s21  ;;  %421 = vrot.lane.b32.xlu1 %v1250_v8, %s1096_s27 }
  0xd5   : > { %460 = vrot.lane.b32.xlu0 %v1250_v8, %s1098_s23  ;;  %449 = vrot.lane.b32.xlu1 %v1257_v10, %s1099_s29 }
  0xd9   : > { %593 = vperm.xlu0 %990, %v590_v11   ;;  %447 = vrot.lane.b32.xlu1 %v1250_v8, %s1099_s29  ;;  %v1355_v11 = vld [vmem:[#allocation3 + $0x68] sm:$0xff] }
  0xdd   : > { %462 = vrot.lane.b32.xlu1 %v1257_v10, %s1098_s23 }
  0xe1   : > { %601 = vperm.xlu1 %991, %v598_v12   ;;  %v1357_v12 = vld [vmem:[#allocation3 + $0x78] sm:$0xff] }
 0x12f   : > { %v381_v13 = vpop.permute.xlu0 %380  ;;  %v368_v14 = vpop.permute.xlu1 %367 }
 0x130   : > { %389 = vst.msk [vmem:[#allocation2 + $0x10] sm:$0xff] %vm388_vm0, %v381_v13 }
 0x131   : > { %376 = vst.msk [vmem:[#allocation2] sm:$0xff] %vm375_vm1, %v368_v14 }
 0x133   : > { %v394_v15 = vpop.permute.xlu0 %393  ;;  %v370_v16 = vpop.permute.xlu1 %369 }
 0x134   : > { %402 = vst.msk [vmem:[#allocation2 + $0x20] sm:$0xff] %vm401_vm2, %v394_v15  ;;  %v372_v17 = vsel %vm371_vm3, %v368_v14, %v370_v16  ;;  %v1361_v14 = vld [vmem:[#allocation3 + $0x60] sm:$0xff] }
 0x135   : > { %379 = vst.msk [vmem:[#allocation2] sm:$0xff] %vm371_vm3, %v370_v16  ;;  %v510_v23 = vmul.f32 %v1298_v18, %v372_v17 }
 0x137   : > { %v407_v20 = vpop.permute.xlu0 %406  ;;  %v383_v21 = vpop.permute.xlu1 %382 }
 0x138   : > { %415 = vst.msk [vmem:[#allocation2 + $0x30] sm:$0xff] %vm414_vm4, %v407_v20  ;;  %v385_v22 = vsel %vm384_vm5, %v381_v13, %v383_v21 }
 0x139   : > { %392 = vst.msk [vmem:[#allocation2 + $0x10] sm:$0xff] %vm384_vm5, %v383_v21  ;;  %v512_v24 = vmul.f32 %v1300_v19, %v385_v22 }
 0x13b   : > { %v424_v25 = vpop.permute.xlu0 %423  ;;  %v396_v26 = vpop.permute.xlu1 %395  ;;  %v528_v27 = vpack.c.bf16 %v512_v24, %v510_v23 }
 0x13c   : > { %430 = vst.msk [vmem:[#allocation2 + $0x58] sm:$0xff] %vm425_vm6, %v424_v25  ;;  %v473_v28 = vld [vmem:[#allocation2] sm:$0xff]  ;;  %v398_v31 = vsel %vm397_vm7, %v394_v15, %v396_v26  ;;  %v1363_v15 = vld [vmem:[#allocation3 + $0x80] sm:$0xff] }
 0x13d   : > { %405 = vst.msk [vmem:[#allocation2 + $0x20] sm:$0xff] %vm397_vm7, %v396_v26  ;;  %549 = vmatprep.subr.bf16.mxu0 %v528_v27  ;;  %v509_v38 = vmul.f32 %v1309_v29, %v473_v28  ;;  %v514_v40 = vmul.f32 %v1314_v32, %v398_v31 }
 0x13f   : > { %v437_v34 = vpop.permute.xlu0 %436  ;;  %v409_v35 = vpop.permute.xlu1 %408 }
 0x140   : > { %v475_v36 = vld [vmem:[#allocation2 + $0x10] sm:$0xff]  ;;  %443 = vst.msk [vmem:[#allocation2 + $0x68] sm:$0xff] %vm438_vm8, %v437_v34  ;;  %v411_v37 = vsel %vm410_vm9, %v407_v20, %v409_v35 }
 0x141   : > { %418 = vst.msk [vmem:[#allocation2 + $0x30] sm:$0xff] %vm410_vm9, %v409_v35  ;;  %v511_v39 = vmul.f32 %v1311_v30, %v475_v36  ;;  %v516_v41 = vmul.f32 %v1316_v33, %v411_v37  ;;  %v537_v36 = vld [vmem:[%s1520_s3] sm:$0xf] }
 0x143   : > { %v527_v42 = vpack.c.bf16 %v511_v39, %v509_v38  ;;  %v435_v43 = vpop.permute.xlu0 %434  ;;  %v422_v44 = vpop.permute.xlu1 %421  ;;  %v530_v45 = vpack.c.bf16 %v516_v41, %v514_v40 }
 0x144   : > { %446 = vst.msk [vmem:[#allocation2 + $0x68] sm:$0xff] %vm445_vm10, %v435_v43  ;;  %v477_v46 = vld [vmem:[#allocation2 + $0x20] sm:$0xff]  ;;  %v426_v51 = vsel %vm425_vm6, %v422_v44, %v424_v25  ;;  %v439_v8 = vsel %vm438_vm8, %v435_v43, %v437_v34  ;;  %v1370_v25 = vld [vmem:[#allocation3 + $0x88] sm:$0xff] }
 0x145   : > { %433 = vst.msk [vmem:[#allocation2 + $0x58] sm:$0xff] %vm432_vm11, %v422_v44  ;;  %550 = vmatpush1.bf16.msra.mxu0 %v527_v42  ;;  %v513_v52 = vmul.f32 %v1327_v47, %v477_v46  ;;  %v519_v61 = vmul.f32 %v1335_v54, %v426_v51  ;;  %v521_v22 = vmul.f32 %v1361_v14, %v439_v8 }
 0x146   : > { %551 = vmatprep.subr.bf16.mxu0 %v530_v45 }
 0x147   : > { %v450_v49 = vpop.permute.xlu1 %449  ;;  %v531_v3 = vpack.c.bf16 %v519_v61, %v517_v0  ;;  %v461_v5 = vpop.permute.xlu0 %460 }
 0x148   : > { %v479_v50 = vld [vmem:[#allocation2 + $0x30] sm:$0xff]  ;;  %456 = vst.msk [vmem:[#allocation2 + $0x78] sm:$0xff] %vm451_vm12, %v450_v49 }
 0x149   : > { %v515_v53 = vmul.f32 %v1329_v48, %v479_v50 }
 0x14b   : > { %v529_v57 = vpack.c.bf16 %v515_v53, %v513_v52  ;;  %v448_v59 = vpop.permute.xlu1 %447  ;;  %v486_v10 = vld [vmem:[#allocation2 + $0x68] sm:$0xff] }
 0x14c   : > { %v484_v60 = vld [vmem:[#allocation2 + $0x58] sm:$0xff]  ;;  %459 = vst.msk [vmem:[#allocation2 + $0x78] sm:$0xff] %vm458_vm13, %v448_v59  ;;  %v452_v7 = vsel %vm451_vm12, %v448_v59, %v450_v49  ;;  %v522_v20 = vmul.f32 %v1355_v11, %v486_v10  ;;  %v763_v49 = vld [vmem:[%s1524_s7] sm:$0xff] }
 0x14d   : > { %552 = vmatpush1.bf16.msra.mxu0 %v529_v57  ;;  %v520_v63 = vmul.f32 %v1339_v56, %v484_v60  ;;  %v523_v17 = vmul.f32 %v1352_v9, %v452_v7 }
 0x14f   : > { %v532_v1 = vpack.c.bf16 %v520_v63, %v518_v62  ;;  %v463_v2 = vpop.permute.xlu1 %462  ;;  %v533_v26 = vpack.c.bf16 %v523_v17, %v521_v22 }
 0x150   : > { %469 = vst.msk [vmem:[#allocation2 + $0x88] sm:$0xff] %vm1531_vm14, %v463_v2  ;;  %v465_v13 = vsel %vm1531_vm14, %v461_v5, %v463_v2  ;;  %vm538_vm14 = vcmask 588800  }
 0x151   : > { %553 = vmatprep.subr.bf16.mxu0 %v532_v1  ;;  %472 = vst.msk [vmem:[#allocation2 + $0x88] sm:$0xff] %vm1530_vm15, %v461_v5  ;;  %v525_v23 = vmul.f32 %v1363_v15, %v465_v13  ;;  %vm542_vm15 = vcmask 1043456  }
 0x152   : > { %554 = vmatpush1.bf16.msra.mxu0 %v531_v3 }
 0x153   : > { %v488_v16 = vld [vmem:[#allocation2 + $0x78] sm:$0xff]  ;;  %v535_v31 = vpack.c.bf16 %v525_v23, %v525_v23 }
 0x154   : > { %v524_v21 = vmul.f32 %v1357_v12, %v488_v16 }
 0x155   : > { %v544_v35 = vsel %vm542_vm15, %v535_v31, 0 }
 0x156   : > { %v534_v24 = vpack.c.bf16 %v524_v21, %v522_v20 }
 0x158   : > { %555 = vmatprep.subr.bf16.mxu0 %v534_v24  ;;  %v490_v27 = vld [vmem:[#allocation2 + $0x88] sm:$0xff]  ;;  %v594_v37 = vpop.permute.xlu0 %593 }
 0x159   : > { %556 = vmatpush1.bf16.msra.mxu0 %v533_v26  ;;  %v526_v28 = vmul.f32 %v1370_v25, %v490_v27 }
 0x15b   : > { %v536_v34 = vpack.c.bf16 %v526_v28, %v526_v28 }
 0x15d   : > { %918 = vmatprep.subr.msk.bf16.mxu0 %vm542_vm15, %v536_v34 }
 0x15e   : > { %558 = vmatpush1.bf16.msra.mxu0 %v544_v35 }
 0x160   : > { %v602_v39 = vpop.permute.xlu1 %601 }
 0x161   : > { %919 = vmatmul.mubr.msk.bf16.vlgmr.msra.gmra.mrb[0].mxu0 %vm538_vm14, %v537_v36 }
 0x234   : > { %v583_v38 = vpop.f32.mrb[0].mxu0 }
 0x235   : > { %v596_v40 = vmul.f32 %v594_v37, %v583_v38  ;;  %v585_v41 = vpop.f32.mrb[1].mxu0 }
 0x236   : > { %v597_v42 = vmul.f32 %v594_v37, %v585_v41  ;;  %v587_v43 = vpop.f32.mrb[2].mxu0 }
 0x237   : > { %v1379_v44 = vadd.f32 %v602_v39, %v596_v40  ;;  %v588_v45 = vpop.f32.mrb[3].mxu0 }
 0x238   : > { %v1381_v46 = vadd.f32 %v602_v39, %v597_v42 }
 0x239   : > { %654 = vrot.lane.b32.xlu1 %v1379_v44, %s1096_s27  ;;  %608 = vrot.lane.b32.xlu0 %v1379_v44, %s1093_s26  ;;  %v742_v40 = vmul.f32 %v1379_v44, %v1341_v58 }
 0x23d   : > { %619 = vrot.lane.b32.xlu0 %v1379_v44, %s1092_s25  ;;  %610 = vrot.lane.b32.xlu1 %v1381_v46, %s1093_s26  ;;  %s1100_s26 = smov [#allocation6]  }
 0x241   : > { %630 = vrot.lane.b32.xlu0 %v1379_v44, %s1094_s28  ;;  %621 = vrot.lane.b32.xlu1 %v1381_v46, %s1092_s25 }
 0x245   : > { %641 = vrot.lane.b32.xlu0 %v1379_v44, %s1095_s24  ;;  %632 = vrot.lane.b32.xlu1 %v1381_v46, %s1094_s28  ;;  %s1024_s28 = sshll.u32 %s1100_s26, 4  ;;  %s1025_s28 = int_to_ptr.vmem [resolvable:$false] %s1024_s28 }
 0x249   : > { %665 = vrot.lane.b32.xlu0 %v1379_v44, %s1097_s21  ;;  %643 = vrot.lane.b32.xlu1 %v1381_v46, %s1095_s24  ;;  %s1026_s24 = scalar_lea.vmem %s1025_s28, 512 }
 0x24d   : > { %656 = vrot.lane.b32.xlu0 %v1381_v46, %s1096_s27  ;;  %676 = vrot.lane.b32.xlu1 %v1379_v44, %s1099_s29  ;;  %s338_s27 = sand.u32 1, %s1078_s10  }
 0x251   : > { %667 = vrot.lane.b32.xlu0 %v1381_v46, %s1097_s21  ;;  %678 = vrot.lane.b32.xlu1 %v1381_v46, %s1099_s29  ;;  %s915_s21 = sshll.u32 %s338_s27, 4 }
 0x252   : > { %s340_s29 = scalar_lea.vmem [#allocation6], %s915_s21 }
 0x253   : > { %s838_s17 = sshll.u32 %s340_s29, 4  ;;  %s1477_s17 = int_to_ptr.vmem [resolvable:$true] %s838_s17 }
 0x254   : > { %s1020_s25 = scalar_lea.vmem %s1477_s17, 256  ;;  %p1027_p2 = scmp.lt.s32.totalorder %s1477_s17, %s1025_s28 }
 0x255   : > { %687 = vrot.lane.b32.xlu0 %v1379_v44, %s1098_s23  ;;  %689 = vrot.lane.b32.xlu1 %v1381_v46, %s1098_s23  ;;  %s928_s23 = sshll.u32 %s1172_s13, 8  ;;  %s824_s13 = scalar_lea.sflag [#allocation5], %s338_s27 }
 0x256   : > { %s1475_s16 = scalar_lea.hbm %s1526_s9, %s928_s23  ;;  %p1021_p6 = scmp.ne.s32.totalorder %s1477_s17, %s1020_s25 }
 0x257   : > { %p1028_p3 = scmp.lt.s32.totalorder %s1026_s24, %s1020_s25 }
 0x258   : > { %p1022_p10 = pnand %p1021_p6, %p1542_p9 }
 0x259   : > { %766 = vperm.xlu0 %990, %v763_v49   ;;  %p1029_p4 = por %p1028_p3, %p1027_p2 }
 0x25a   : > { %p1023_p12 = pneg %p1022_p10 }
 0x25c   : > { %p1030_p7 = pnand %p1029_p4, %p1023_p12 }
 0x2ab   : > { %v655_v50 = vpop.permute.xlu1 %654  ;;  %v609_v51 = vpop.permute.xlu0 %608 }
 0x2ac   : > { %615 = vst.msk [vmem:[#allocation2] sm:$0xff] %vm375_vm1, %v609_v51 }
 0x2af   : > { %v620_v52 = vpop.permute.xlu0 %619  ;;  %v611_v53 = vpop.permute.xlu1 %610 }
 0x2b0   : > { %626 = vst.msk [vmem:[#allocation2 + $0x10] sm:$0xff] %vm388_vm0, %v620_v52  ;;  %v612_v57 = vsel %vm371_vm3, %v609_v51, %v611_v53  ;;  %vm1539_vm0 = vcmask 908288  }
 0x2b1   : > { %618 = vst.msk [vmem:[#allocation2] sm:$0xff] %vm371_vm3, %v611_v53  ;;  %v735_v62 = vmul.f32 %v612_v57, %v1298_v18  ;;  %vm1540_vm1 = vmmov %vm1539_vm0 }
 0x2b3   : > { %v631_v59 = vpop.permute.xlu0 %630  ;;  %v622_v60 = vpop.permute.xlu1 %621 }
 0x2b4   : > { %637 = vst.msk [vmem:[#allocation2 + $0x20] sm:$0xff] %vm401_vm2, %v631_v59  ;;  %v623_v61 = vsel %vm384_vm5, %v620_v52, %v622_v60  ;;  %vm1541_vm2 = vcmask 1048440  }
 0x2b5   : > { %629 = vst.msk [vmem:[#allocation2 + $0x10] sm:$0xff] %vm384_vm5, %v622_v60  ;;  %v737_v63 = vmul.f32 %v623_v61, %v1300_v19 }
 0x2b7   : > { %v642_v0 = vpop.permute.xlu0 %641  ;;  %v633_v1 = vpop.permute.xlu1 %632  ;;  %v753_v2 = vpack.c.bf16 %v737_v63, %v735_v62 }
 0x2b8   : > { %648 = vst.msk [vmem:[#allocation2 + $0x30] sm:$0xff] %vm414_vm4, %v642_v0  ;;  %v634_v3 = vsel %vm397_vm7, %v631_v59, %v633_v1  ;;  %v698_v5 = vld [vmem:[#allocation2] sm:$0xff] }
 0x2b9   : > { %640 = vst.msk [vmem:[#allocation2 + $0x20] sm:$0xff] %vm397_vm7, %v633_v1  ;;  %778 = vmatprep.subr.bf16.mxu1 %v753_v2  ;;  %v734_v18 = vmul.f32 %v698_v5, %v1309_v29  ;;  %v739_v16 = vmul.f32 %v634_v3, %v1314_v32 }
 0x2bb   : > { %v666_v7 = vpop.permute.xlu0 %665  ;;  %v644_v10 = vpop.permute.xlu1 %643 }
 0x2bc   : > { %v700_v8 = vld [vmem:[#allocation2 + $0x10] sm:$0xff]  ;;  %v645_v13 = vsel %vm410_vm9, %v642_v0, %v644_v10  ;;  %651 = vst.msk [vmem:[#allocation2 + $0x30] sm:$0xff] %vm410_vm9, %v644_v10 }
 0x2bd   : > { %v736_v19 = vmul.f32 %v700_v8, %v1311_v30  ;;  %v741_v17 = vmul.f32 %v645_v13, %v1316_v33 }
 0x2bf   : > { %v752_v20 = vpack.c.bf16 %v736_v19, %v734_v18  ;;  %v657_v21 = vpop.permute.xlu0 %656  ;;  %v677_v22 = vpop.permute.xlu1 %676  ;;  %v755_v23 = vpack.c.bf16 %v741_v17, %v739_v16 }
 0x2c0   : > { %v658_v24 = vsel %vm425_vm6, %v655_v50, %v657_v21  ;;  %662 = vst.msk [vmem:[#allocation2 + $0x58] sm:$0xff] %vm425_vm6, %v657_v21  ;;  %v702_v26 = vld [vmem:[#allocation2 + $0x20] sm:$0xff] }
 0x2c1   : > { %779 = vmatpush1.bf16.msra.mxu1 %v752_v20  ;;  %664 = vst.msk [vmem:[#allocation2 + $0x58] sm:$0xff] %vm432_vm11, %v655_v50  ;;  %v738_v28 = vmul.f32 %v702_v26, %v1327_v47  ;;  %v744_v39 = vmul.f32 %v658_v24, %v1335_v54  ;;  %v743_v47 = vmul.f32 %v1381_v46, %v1337_v55 }
 0x2c2   : > { %780 = vmatprep.subr.bf16.mxu1 %v755_v23 }
 0x2c3   : > { %v668_v29 = vpop.permute.xlu0 %667  ;;  %v679_v27 = vpop.permute.xlu1 %678  ;;  %v704_v30 = vld [vmem:[#allocation2 + $0x30] sm:$0xff]  ;;  %v756_v42 = vpack.c.bf16 %v744_v39, %v742_v40 }
 0x2c4   : > { %v669_v32 = vsel %vm438_vm8, %v666_v7, %v668_v29  ;;  %673 = vst.msk [vmem:[#allocation2 + $0x68] sm:$0xff] %vm438_vm8, %v668_v29  ;;  %v680_v33 = vsel %vm451_vm12, %v677_v22, %v679_v27  ;;  %v740_v31 = vmul.f32 %v704_v30, %v1329_v48 }
 0x2c5   : > { %684 = vst.msk [vmem:[#allocation2 + $0x78] sm:$0xff] %vm451_vm12, %v679_v27  ;;  %v746_v49 = vmul.f32 %v669_v32, %v1361_v14  ;;  %v748_v50 = vmul.f32 %v680_v33, %v1352_v9 }
 0x2c6   : > { %675 = vst.msk [vmem:[#allocation2 + $0x68] sm:$0xff] %vm445_vm10, %v666_v7  ;;  %v754_v34 = vpack.c.bf16 %v740_v31, %v738_v28 }
 0x2c7   : > { %686 = vst.msk [vmem:[#allocation2 + $0x78] sm:$0xff] %vm458_vm13, %v677_v22  ;;  %v688_v35 = vpop.permute.xlu0 %687  ;;  %v690_v36 = vpop.permute.xlu1 %689  ;;  %v758_v46 = vpack.c.bf16 %v748_v50, %v746_v49 }
 0x2c8   : > { %v691_v37 = vsel %vm1539_vm0, %v688_v35, %v690_v36  ;;  %695 = vst.msk [vmem:[#allocation2 + $0x88] sm:$0xff] %vm1540_vm1, %v690_v36  ;;  %781 = vmatpush1.bf16.msra.mxu1 %v754_v34  ;;  %v709_v38 = vld [vmem:[#allocation2 + $0x58] sm:$0xff] }
 0x2c9   : > { %697 = vst.msk [vmem:[#allocation2 + $0x88] sm:$0xff] %vm1541_vm2, %v688_v35  ;;  %v745_v48 = vmul.f32 %v709_v38, %v1339_v56  ;;  %v750_v55 = vmul.f32 %v691_v37, %v1363_v15 }
 0x2cb   : > { %v757_v41 = vpack.c.bf16 %v745_v48, %v743_v47  ;;  %v760_v52 = vpack.c.bf16 %v750_v55, %v750_v55 }
 0x2cd   : > { %v711_v43 = vld [vmem:[#allocation2 + $0x68] sm:$0xff]  ;;  %782 = vmatprep.subr.bf16.mxu1 %v757_v41  ;;  %v773_v9 = vsel %vm542_vm15, %v760_v52, 0 }
 0x2ce   : > { %v713_v45 = vld [vmem:[#allocation2 + $0x78] sm:$0xff]  ;;  %v747_v54 = vmul.f32 %v711_v43, %v1355_v11  ;;  %783 = vmatpush1.bf16.msra.mxu1 %v756_v42  ;;  %v762_v11 = vld [vmem:[%s1523_s6] sm:$0xf] }
 0x2cf   : > { %v749_v51 = vmul.f32 %v713_v45, %v1357_v12 }
 0x2d0   : > { %v715_v58 = vld [vmem:[#allocation2 + $0x88] sm:$0xff] }
 0x2d1   : > { %v759_v56 = vpack.c.bf16 %v749_v51, %v747_v54  ;;  %v751_v44 = vmul.f32 %v715_v58, %v1370_v25 }
 0x2d3   : > { %784 = vmatprep.subr.bf16.mxu1 %v759_v56  ;;  %v761_v14 = vpack.c.bf16 %v751_v44, %v751_v44 }
 0x2d4   : > { %785 = vmatpush1.bf16.msra.mxu1 %v758_v46 }
 0x2d5   : > { %920 = vmatprep.subr.msk.bf16.mxu1 %vm542_vm15, %v761_v14 }
 0x2d8   : > { %787 = vmatpush1.bf16.msra.mxu1 %v773_v9  ;;  %v767_v12 = vpop.permute.xlu0 %766 }
 0x2db   : > { %921 = vmatmul.mubr.msk.bf16.vlgmr.msra.gmra.mrb[0].mxu1 %vm538_vm14, %v762_v11 }
 0x3ae   : > { %v812_v15 = vpop.f32.mrb[0].mxu1 }
 0x3af   : > { %v813_v53 = vadd.f32 %v812_v15, %v767_v12  ;;  %v814_v25 = vpop.f32.mrb[1].mxu1 }
 0x3b0   : > { %v815_v57 = vadd.f32 %v814_v25, %v767_v12  ;;  %v816_v59 = vpop.f32.mrb[2].mxu1 }
 0x3b1   : > { %v819_v60 = vadd.f32 %v813_v53, %v1245_v4  ;;  %v817_v61 = vpop.f32.mrb[3].mxu1 }
 0x3b2   : > { %v820_v62 = vadd.f32 %v815_v57, %v1248_v6 }
 0x3b3   : > { %821 = vst [vmem:[%s340_s29] sm:$0xff] %v819_v60 }
 0x3b4   : > { %822 = vst [vmem:[%s340_s29 + $0x8] sm:$0xff] %v820_v62 }
 0x3b5   : > { %1033 = shalt.err (!%p1030_p7)
}
 0x3b6   : > { %s1034_s27 = scalar_lea.hbm %s1475_s16, 256  ;;  %s1038_s29 = scalar_lea.hbm %s1526_s9, 512 }
 0x3b7   : > { %p1035_p8 = scmp.ne.s32.totalorder %s1475_s16, %s1034_s27  ;;  %p1039_p1 = scmp.lt.u32.totalorder %s1475_s16, %s1526_s9 }
 0x3b8   : > { %p1040_p0 = scmp.lt.u32.totalorder %s1038_s29, %s1034_s27  ;;  %p1042_p6 = scmp.lt.u32.totalorder %s1034_s27, %s1475_s16 }
 0x3b9   : > { %p1036_p11 = pnand %p1035_p8, %p1542_p9 }
 0x3ba   : > { %p1041_p5 = por %p1040_p0, %p1039_p1 }
 0x3bb   : > { %p1037_p13 = pneg %p1036_p11 }
 0x3bc   : > { %p1043_p10 = por %p1042_p6, %p1041_p5 }
 0x3be   : > { %p1044_p12 = pnand %p1043_p10, %p1037_p13 }
 0x3c0   : > { %1047 = shalt.err (!%p1044_p12)
}
 0x3c1   : > { %933 = dma.vmem_to_hbm [thread:$0]  (%p1542_p9), %s1477_s17, 256, %s1475_s16, %s824_s13  }
 0x3c2 PF: > { %p945_p2 = scmp.ge.s32.totalorder %s1086_s12, 2  ;;  %s850_s25 = sand.u32 1, %s1074_s30  }
 0x3c3   : > { %p1543_p3 = scmp.ne.s32.totalorder %s1533_s20, 0  ;;  %s851_s26 = scalar_lea.sflag [#allocation5], %s850_s25 }
 0x3c5   : > { %p940_p4 = pnand %p945_p2, %p1543_p3 }
 0x3c7   : > { %1069 = dma.done.wait (!%p940_p4), %s851_s26, 256  }
 0x3c8   : > { %1071 = vsyncadd (!%p940_p4), %s851_s26, 4294967040  ;;  %p20_p7 = scmp.ge.s32.totalorder %s1176_s15, 4   ;;  %s1544_s30 = smov %s1078_s10 }
 0x3c9   : > { %s1545_s10 = smov %s1082_s11  ;;  %s1546_s11 = smov %s1187_s18 }
 0x3ca   : > { %s1547_s12 = smov %s1176_s15  ;;  %22 = sbr.rel (!%p20_p7) target bundleno = 4 (0x4), region = 96 }
 0x3d1   :  { %856 = vsyncpa [#allocation4], 1 }
 0x3d2   :  { %858 = vsyncpa [#allocation4 + $0x1], 1 }
 0x3d3   :  { %859 = vsyncpa [#allocation5], 1 }
 0x3d4   :  { %861 = vsyncpa [#allocation5 + $0x1], 1 }

</bundles_post_ra>
